<compile_context>
chip_gen: v7x
topology: tpu7x:2x2x1
jax: 0.10.0
libtpu: 0.0.40
codegen_flags: <defaults>
</compile_context>

<pallas_src>
import functools

import jax
import jax.numpy as jnp
from jax.experimental import pallas as pl
from jax.experimental.pallas import tpu as pltpu


# --------------------------------------------------------------------------- #
# Kernel
# --------------------------------------------------------------------------- #
def _bspline3d_kernel(x_ref, knots_ref, w_ref, o_ref, *, compute_dtype):
    # x_ref:     (r_tile, c_tile) VMEM tile of one (batch, channel) volume
    # knots_ref: (K,)             SMEM knot positions (f32)
    # w_ref:     (C*K,)           SMEM per-channel spline weights (f32, flat)
    # o_ref:     (r_tile, c_tile) VMEM output tile
    c = pl.program_id(1)                       # channel that owns this block
    num_knots = knots_ref.shape[0]

    x = x_ref[...].astype(compute_dtype)

    def term(k):
        # Scalar knot / weight read from SMEM and cast to the compute dtype;
        # every vector op then has a splatted scalar operand (no (rows,1) ->
        # (rows,cols) broadcast materialized from VMEM).
        t = jnp.maximum(x - knots_ref[k].astype(compute_dtype), 0.0)
        w = w_ref[c * num_knots + k].astype(compute_dtype)
        return (w * t) * (t * t)

    # k = 0 term seeds the accumulator (saves a zero-fill + add).  K is small
    # (10) so the chain is statically unrolled.
    acc = term(0)
    for k in range(1, num_knots):
        acc = acc + term(k)

    o_ref[...] = acc.astype(o_ref.dtype)


# --------------------------------------------------------------------------- #
# Device / layout / tiling heuristics
# --------------------------------------------------------------------------- #
def _device_kind():
    try:
        return jax.devices()[0].device_kind.lower()
    except Exception:
        return ""


def _default_compute_dtype():
    """bf16 VALU exists on v6e / v7x; v4/v5 would emulate it -> keep f32."""
    kind = _device_kind()
    if "v6" in kind or "v7" in kind:
        return jnp.bfloat16
    return jnp.float32


def _vmem_cap_bytes():
    """Upper bound for the scoped-VMEM request (v7x has only 64 MiB physical)."""
    kind = _device_kind()
    if "v7" in kind:
        return 48 * 1024 * 1024
    return 96 * 1024 * 1024


def _choose_layout(D, H, W):
    """Factor the per-(b,c) volume D*H*W into a 2-D (rows, cols) view.

    Any factorization rows*cols == D*H*W is a free reshape of the contiguous
    trailing dims.  Prefer full vregs (rows >= 8, cols >= 128), an exactly
    lane-tileable extent (cols % 128 == 0, no masked partial stores), and a
    wide lane dimension.
    """
    N = D * H * W
    candidates = [(D, H * W), (D * H, W), (1, N)]

    # cols = multiples of 128 that divide N (exact lane tiling).
    cap = min(N, 65536)
    cols = (cap // 128) * 128
    while cols >= 128:
        if N % cols == 0:
            candidates.append((N // cols, cols))
        cols -= 128

    # rows = small multiples of 8 that divide N (full sublanes, wide lanes).
    r = 8
    while r <= min(N, 1024):
        if N % r == 0:
            candidates.append((r, N // r))
        r += 8

    def score(rc):
        rr, cc = rc
        return (min(rr, 8) * min(cc, 128),   # vreg utilization of a full block
                cc % 128 == 0,               # unmasked lane tiling
                cc)                          # lane-dense stores
    return max(candidates, key=score)


def _choose_tiles(rows, cols, itemsize, target_block_bytes):
    """Pick (r_tile, c_tile) obeying the (8, 128) BlockSpec rule within a
    per-block budget.  Non-dividing tiles are fine: the pl.cdiv grid makes
    Pallas mask the writeback of partial edge blocks."""
    budget = max(8 * 128, target_block_bytes // itemsize)   # elements
    if rows * cols <= budget:
        return rows, cols                                    # whole (b,c) volume
    if cols * min(rows, 8) <= budget:
        # Full lane extent; tile sublanes in multiples of 8.
        r_tile = max(8, ((budget // cols) // 8) * 8)
        return min(r_tile, rows), cols
    # Tile lanes too (multiples of 128), 8 sublanes (or full extent if rows<8).
    r_tile = min(rows, 8)
    c_tile = max(128, ((budget // r_tile) // 128) * 128)
    return r_tile, c_tile


# --------------------------------------------------------------------------- #
# Wrapper
# --------------------------------------------------------------------------- #
def bspline3d_forward(x, knots, weights, *, compute_dtype=None,
                      target_block_bytes=4 * 1024 * 1024):
    """x: (B, C, D, H, W); knots: (K,); weights: (C, K) -> (B, C, D, H, W)."""
    B, C, D, H, W = x.shape
    K = knots.shape[0]
    itemsize = jnp.dtype(x.dtype).itemsize
    if compute_dtype is None:
        compute_dtype = _default_compute_dtype()
    compute_itemsize = jnp.dtype(compute_dtype).itemsize

    # Free reshapes (contiguous-dim re-factoring) -- no extra HBM pass.
    rows, cols = _choose_layout(D, H, W)
    x4 = x.reshape(B, C, rows, cols)
    # TODO(synk): for very large C, switch weights to a per-channel (1, K) SMEM
    # block (index_map -> (c, 0)) to bound SMEM use (flat f32[C*K] pads to
    # next_pow2(4*C*K) bytes).
    w_flat = weights.reshape(C * K)

    r_tile, c_tile = _choose_tiles(rows, cols, itemsize, target_block_bytes)

    # v7x megacore: make sure there are >= 2 blocks so both TCs get work.
    if B * C * pl.cdiv(rows, r_tile) * pl.cdiv(cols, c_tile) < 2:
        if r_tile >= 16:
            r_tile = max(8, (r_tile // 2 // 8) * 8)
        elif c_tile >= 256:
            c_tile = max(128, (c_tile // 2 // 128) * 128)

    grid = (B, C, pl.cdiv(rows, r_tile), pl.cdiv(cols, c_tile))
    block = pl.BlockSpec((None, None, r_tile, c_tile),
                         lambda b, c, d, s: (b, c, d, s))

    # VMEM: double-buffered in + out tiles (I/O dtype) plus ~6 full-tile
    # elementwise temporaries (compute dtype) inside the unrolled knot chain.
    block_elems = r_tile * c_tile
    vmem_need = (4 * block_elems * itemsize
                 + 6 * block_elems * compute_itemsize
                 + 2 * 1024 * 1024)
    vmem_limit = int(min(_vmem_cap_bytes(), max(32 * 1024 * 1024, vmem_need)))

    out = pl.pallas_call(
        functools.partial(_bspline3d_kernel, compute_dtype=compute_dtype),
        out_shape=jax.ShapeDtypeStruct((B, C, rows, cols), x.dtype),
        grid_spec=pltpu.PrefetchScalarGridSpec(
            num_scalar_prefetch=0,
            grid=grid,
            in_specs=[
                block,                                               # x tile
                pl.BlockSpec(memory_space=pltpu.MemorySpace.SMEM),   # knots
                pl.BlockSpec(memory_space=pltpu.MemorySpace.SMEM),   # weights
            ],
            out_specs=block,
        ),
        compiler_params=pltpu.CompilerParams(
            dimension_semantics=("parallel", "parallel", "parallel", "parallel"),
            vmem_limit_bytes=vmem_limit,
        ),
    )(x4, knots, w_flat)

    return out.reshape(B, C, D, H, W)


# --------------------------------------------------------------------------- #
# Reference & test
# --------------------------------------------------------------------------- #
def bspline3d_reference(x, knots, weights):
    basis = jnp.maximum(x[..., None] - knots, 0.0) ** 3
    # Pure-VPU reduction (avoids MXU default-precision ambiguity in einsum).
    return jnp.sum(basis * weights[None, :, None, None, None, :], axis=-1)


if __name__ == "__main__":
    key = jax.random.PRNGKey(0)
    B, C, D, H, W = 2, 4, 4, 8, 16
    num_knots = 10

    kx, kw = jax.random.split(key)
    x = jax.random.normal(kx, (B, C, D, H, W), dtype=jnp.float32)
    knots = jnp.linspace(-1.0, 1.0, num_knots, dtype=jnp.float32)
    weights = jax.random.normal(kw, (C, num_knots), dtype=jnp.float32)

    ref = bspline3d_reference(x, knots, weights)

    # 1) Exact path: f32 compute, tight tolerance.
    out_f32 = jax.block_until_ready(
        bspline3d_forward(x, knots, weights, compute_dtype=jnp.float32))
    assert out_f32.shape == (B, C, D, H, W)
    assert jnp.allclose(out_f32, ref, atol=1e-3, rtol=1e-4)

    # 2) Default path (bf16 compute on v6e/v7x, f32 elsewhere): looser,
    #    norm-relative check (cubic basis amplifies bf16 rounding).
    out_auto = jax.block_until_ready(bspline3d_forward(x, knots, weights))
    rel_err = jnp.linalg.norm(out_auto - ref) / jnp.linalg.norm(ref)
    assert rel_err < 5e-2

    # 3) Non-divisible shapes with tiny blocks to exercise masked writeback of
    #    partial edge blocks (f32 compute, tight tolerance).
    def _edge_case(shape):
        ke_x, ke_w = jax.random.split(jax.random.PRNGKey(1))
        _, Ce = shape[0], shape[1]
        xe = jax.random.normal(ke_x, shape, dtype=jnp.float32)
        we = jax.random.normal(ke_w, (Ce, num_knots), dtype=jnp.float32)
        oute = jax.block_until_ready(
            bspline3d_forward(xe, knots, we, compute_dtype=jnp.float32,
                              target_block_bytes=8 * 128 * 4))
        refe = bspline3d_reference(xe, knots, we)
        assert oute.shape == shape
        assert jnp.allclose(oute, refe, atol=1e-3, rtol=1e-4), shape

    _edge_case((1, 2, 16, 10, 30))   # partial lane edge blocks (cols=600)
    _edge_case((1, 1, 4, 20, 40))    # partial sublane edge blocks (rows=25)

    print("KERNEL_OK")
</pallas_src>

<mosaic_0001>
module attributes {stable_mosaic.version = 11 : i64} {
  func.func @_bspline3d_kernel(%arg0: i32, %arg1: i32, %arg2: i32, %arg3: i32, %arg4: memref<1x1x4x128xf32, #tpu.memory_space<vmem>>, %arg5: memref<10xf32, #tpu.memory_space<smem>>, %arg6: memref<40xf32, #tpu.memory_space<smem>>, %arg7: memref<1x1x4x128xf32, #tpu.memory_space<vmem>>) attributes {dimension_semantics = [#tpu.dimension_semantics<parallel>, #tpu.dimension_semantics<parallel>, #tpu.dimension_semantics<parallel>, #tpu.dimension_semantics<parallel>], iteration_bounds = array<i64: 2, 4, 1, 1>, scalar_prefetch = 0 : i64, scratch_operands = 0 : i64, tpu.core_type = #tpu.core_type<tc>, window_params = [{transform_indices = @transform_0, window_bounds = array<i64: 1, 1, 4, 128>}, {transform_indices = @transform_1, window_bounds = array<i64: 10>}, {transform_indices = @transform_2, window_bounds = array<i64: 40>}, {transform_indices = @transform_3, window_bounds = array<i64: 1, 1, 4, 128>}]} {
    %c0 = arith.constant 0 : index
    %c0_0 = arith.constant 0 : index
    %c0_1 = arith.constant 0 : index
    %c0_2 = arith.constant 0 : index
    %0 = vector.load %arg4[%c0, %c0_0, %c0_1, %c0_2] : memref<1x1x4x128xf32, #tpu.memory_space<vmem>>, vector<1x1x4x128xf32>
    %1 = vector.shape_cast %0 : vector<1x1x4x128xf32> to vector<4x128xf32>
    %c0_3 = arith.constant 0 : index
    %2 = memref.load %arg5[%c0_3] : memref<10xf32, #tpu.memory_space<smem>>
    %3 = vector.broadcast %2 : f32 to vector<4x128xf32>
    %4 = arith.subf %1, %3 : vector<4x128xf32>
    %cst = arith.constant 0.000000e+00 : f32
    %5 = vector.broadcast %cst : f32 to vector<4x128xf32>
    %6 = arith.maximumf %4, %5 : vector<4x128xf32>
    %c10_i32 = arith.constant 10 : i32
    %7 = arith.muli %arg1, %c10_i32 : i32
    %c0_i32 = arith.constant 0 : i32
    %8 = arith.addi %7, %c0_i32 : i32
    %9 = arith.index_cast %8 : i32 to index
    %10 = memref.load %arg6[%9] : memref<40xf32, #tpu.memory_space<smem>>
    %11 = vector.broadcast %10 : f32 to vector<4x128xf32>
    %12 = arith.mulf %11, %6 : vector<4x128xf32>
    %13 = arith.mulf %6, %6 : vector<4x128xf32>
    %14 = arith.mulf %12, %13 : vector<4x128xf32>
    %c1 = arith.constant 1 : index
    %15 = memref.load %arg5[%c1] : memref<10xf32, #tpu.memory_space<smem>>
    %16 = vector.broadcast %15 : f32 to vector<4x128xf32>
    %17 = arith.subf %1, %16 : vector<4x128xf32>
    %cst_4 = arith.constant 0.000000e+00 : f32
    %18 = vector.broadcast %cst_4 : f32 to vector<4x128xf32>
    %19 = arith.maximumf %17, %18 : vector<4x128xf32>
    %c10_i32_5 = arith.constant 10 : i32
    %20 = arith.muli %arg1, %c10_i32_5 : i32
    %c1_i32 = arith.constant 1 : i32
    %21 = arith.addi %20, %c1_i32 : i32
    %22 = arith.index_cast %21 : i32 to index
    %23 = memref.load %arg6[%22] : memref<40xf32, #tpu.memory_space<smem>>
    %24 = vector.broadcast %23 : f32 to vector<4x128xf32>
    %25 = arith.mulf %24, %19 : vector<4x128xf32>
    %26 = arith.mulf %19, %19 : vector<4x128xf32>
    %27 = arith.mulf %25, %26 : vector<4x128xf32>
    %28 = arith.addf %14, %27 : vector<4x128xf32>
    %c2 = arith.constant 2 : index
    %29 = memref.load %arg5[%c2] : memref<10xf32, #tpu.memory_space<smem>>
    %30 = vector.broadcast %29 : f32 to vector<4x128xf32>
    %31 = arith.subf %1, %30 : vector<4x128xf32>
    %cst_6 = arith.constant 0.000000e+00 : f32
    %32 = vector.broadcast %cst_6 : f32 to vector<4x128xf32>
    %33 = arith.maximumf %31, %32 : vector<4x128xf32>
    %c10_i32_7 = arith.constant 10 : i32
    %34 = arith.muli %arg1, %c10_i32_7 : i32
    %c2_i32 = arith.constant 2 : i32
    %35 = arith.addi %34, %c2_i32 : i32
    %36 = arith.index_cast %35 : i32 to index
    %37 = memref.load %arg6[%36] : memref<40xf32, #tpu.memory_space<smem>>
    %38 = vector.broadcast %37 : f32 to vector<4x128xf32>
    %39 = arith.mulf %38, %33 : vector<4x128xf32>
    %40 = arith.mulf %33, %33 : vector<4x128xf32>
    %41 = arith.mulf %39, %40 : vector<4x128xf32>
    %42 = arith.addf %28, %41 : vector<4x128xf32>
    %c3 = arith.constant 3 : index
    %43 = memref.load %arg5[%c3] : memref<10xf32, #tpu.memory_space<smem>>
    %44 = vector.broadcast %43 : f32 to vector<4x128xf32>
    %45 = arith.subf %1, %44 : vector<4x128xf32>
    %cst_8 = arith.constant 0.000000e+00 : f32
    %46 = vector.broadcast %cst_8 : f32 to vector<4x128xf32>
    %47 = arith.maximumf %45, %46 : vector<4x128xf32>
    %c10_i32_9 = arith.constant 10 : i32
    %48 = arith.muli %arg1, %c10_i32_9 : i32
    %c3_i32 = arith.constant 3 : i32
    %49 = arith.addi %48, %c3_i32 : i32
    %50 = arith.index_cast %49 : i32 to index
    %51 = memref.load %arg6[%50] : memref<40xf32, #tpu.memory_space<smem>>
    %52 = vector.broadcast %51 : f32 to vector<4x128xf32>
    %53 = arith.mulf %52, %47 : vector<4x128xf32>
    %54 = arith.mulf %47, %47 : vector<4x128xf32>
    %55 = arith.mulf %53, %54 : vector<4x128xf32>
    %56 = arith.addf %42, %55 : vector<4x128xf32>
    %c4 = arith.constant 4 : index
    %57 = memref.load %arg5[%c4] : memref<10xf32, #tpu.memory_space<smem>>
    %58 = vector.broadcast %57 : f32 to vector<4x128xf32>
    %59 = arith.subf %1, %58 : vector<4x128xf32>
    %cst_10 = arith.constant 0.000000e+00 : f32
    %60 = vector.broadcast %cst_10 : f32 to vector<4x128xf32>
    %61 = arith.maximumf %59, %60 : vector<4x128xf32>
    %c10_i32_11 = arith.constant 10 : i32
    %62 = arith.muli %arg1, %c10_i32_11 : i32
    %c4_i32 = arith.constant 4 : i32
    %63 = arith.addi %62, %c4_i32 : i32
    %64 = arith.index_cast %63 : i32 to index
    %65 = memref.load %arg6[%64] : memref<40xf32, #tpu.memory_space<smem>>
    %66 = vector.broadcast %65 : f32 to vector<4x128xf32>
    %67 = arith.mulf %66, %61 : vector<4x128xf32>
    %68 = arith.mulf %61, %61 : vector<4x128xf32>
    %69 = arith.mulf %67, %68 : vector<4x128xf32>
    %70 = arith.addf %56, %69 : vector<4x128xf32>
    %c5 = arith.constant 5 : index
    %71 = memref.load %arg5[%c5] : memref<10xf32, #tpu.memory_space<smem>>
    %72 = vector.broadcast %71 : f32 to vector<4x128xf32>
    %73 = arith.subf %1, %72 : vector<4x128xf32>
    %cst_12 = arith.constant 0.000000e+00 : f32
    %74 = vector.broadcast %cst_12 : f32 to vector<4x128xf32>
    %75 = arith.maximumf %73, %74 : vector<4x128xf32>
    %c10_i32_13 = arith.constant 10 : i32
    %76 = arith.muli %arg1, %c10_i32_13 : i32
    %c5_i32 = arith.constant 5 : i32
    %77 = arith.addi %76, %c5_i32 : i32
    %78 = arith.index_cast %77 : i32 to index
    %79 = memref.load %arg6[%78] : memref<40xf32, #tpu.memory_space<smem>>
    %80 = vector.broadcast %79 : f32 to vector<4x128xf32>
    %81 = arith.mulf %80, %75 : vector<4x128xf32>
    %82 = arith.mulf %75, %75 : vector<4x128xf32>
    %83 = arith.mulf %81, %82 : vector<4x128xf32>
    %84 = arith.addf %70, %83 : vector<4x128xf32>
    %c6 = arith.constant 6 : index
    %85 = memref.load %arg5[%c6] : memref<10xf32, #tpu.memory_space<smem>>
    %86 = vector.broadcast %85 : f32 to vector<4x128xf32>
    %87 = arith.subf %1, %86 : vector<4x128xf32>
    %cst_14 = arith.constant 0.000000e+00 : f32
    %88 = vector.broadcast %cst_14 : f32 to vector<4x128xf32>
    %89 = arith.maximumf %87, %88 : vector<4x128xf32>
    %c10_i32_15 = arith.constant 10 : i32
    %90 = arith.muli %arg1, %c10_i32_15 : i32
    %c6_i32 = arith.constant 6 : i32
    %91 = arith.addi %90, %c6_i32 : i32
    %92 = arith.index_cast %91 : i32 to index
    %93 = memref.load %arg6[%92] : memref<40xf32, #tpu.memory_space<smem>>
    %94 = vector.broadcast %93 : f32 to vector<4x128xf32>
    %95 = arith.mulf %94, %89 : vector<4x128xf32>
    %96 = arith.mulf %89, %89 : vector<4x128xf32>
    %97 = arith.mulf %95, %96 : vector<4x128xf32>
    %98 = arith.addf %84, %97 : vector<4x128xf32>
    %c7 = arith.constant 7 : index
    %99 = memref.load %arg5[%c7] : memref<10xf32, #tpu.memory_space<smem>>
    %100 = vector.broadcast %99 : f32 to vector<4x128xf32>
    %101 = arith.subf %1, %100 : vector<4x128xf32>
    %cst_16 = arith.constant 0.000000e+00 : f32
    %102 = vector.broadcast %cst_16 : f32 to vector<4x128xf32>
    %103 = arith.maximumf %101, %102 : vector<4x128xf32>
    %c10_i32_17 = arith.constant 10 : i32
    %104 = arith.muli %arg1, %c10_i32_17 : i32
    %c7_i32 = arith.constant 7 : i32
    %105 = arith.addi %104, %c7_i32 : i32
    %106 = arith.index_cast %105 : i32 to index
    %107 = memref.load %arg6[%106] : memref<40xf32, #tpu.memory_space<smem>>
    %108 = vector.broadcast %107 : f32 to vector<4x128xf32>
    %109 = arith.mulf %108, %103 : vector<4x128xf32>
    %110 = arith.mulf %103, %103 : vector<4x128xf32>
    %111 = arith.mulf %109, %110 : vector<4x128xf32>
    %112 = arith.addf %98, %111 : vector<4x128xf32>
    %c8 = arith.constant 8 : index
    %113 = memref.load %arg5[%c8] : memref<10xf32, #tpu.memory_space<smem>>
    %114 = vector.broadcast %113 : f32 to vector<4x128xf32>
    %115 = arith.subf %1, %114 : vector<4x128xf32>
    %cst_18 = arith.constant 0.000000e+00 : f32
    %116 = vector.broadcast %cst_18 : f32 to vector<4x128xf32>
    %117 = arith.maximumf %115, %116 : vector<4x128xf32>
    %c10_i32_19 = arith.constant 10 : i32
    %118 = arith.muli %arg1, %c10_i32_19 : i32
    %c8_i32 = arith.constant 8 : i32
    %119 = arith.addi %118, %c8_i32 : i32
    %120 = arith.index_cast %119 : i32 to index
    %121 = memref.load %arg6[%120] : memref<40xf32, #tpu.memory_space<smem>>
    %122 = vector.broadcast %121 : f32 to vector<4x128xf32>
    %123 = arith.mulf %122, %117 : vector<4x128xf32>
    %124 = arith.mulf %117, %117 : vector<4x128xf32>
    %125 = arith.mulf %123, %124 : vector<4x128xf32>
    %126 = arith.addf %112, %125 : vector<4x128xf32>
    %c9 = arith.constant 9 : index
    %127 = memref.load %arg5[%c9] : memref<10xf32, #tpu.memory_space<smem>>
    %128 = vector.broadcast %127 : f32 to vector<4x128xf32>
    %129 = arith.subf %1, %128 : vector<4x128xf32>
    %cst_20 = arith.constant 0.000000e+00 : f32
    %130 = vector.broadcast %cst_20 : f32 to vector<4x128xf32>
    %131 = arith.maximumf %129, %130 : vector<4x128xf32>
    %c10_i32_21 = arith.constant 10 : i32
    %132 = arith.muli %arg1, %c10_i32_21 : i32
    %c9_i32 = arith.constant 9 : i32
    %133 = arith.addi %132, %c9_i32 : i32
    %134 = arith.index_cast %133 : i32 to index
    %135 = memref.load %arg6[%134] : memref<40xf32, #tpu.memory_space<smem>>
    %136 = vector.broadcast %135 : f32 to vector<4x128xf32>
    %137 = arith.mulf %136, %131 : vector<4x128xf32>
    %138 = arith.mulf %131, %131 : vector<4x128xf32>
    %139 = arith.mulf %137, %138 : vector<4x128xf32>
    %140 = arith.addf %126, %139 : vector<4x128xf32>
    %c0_22 = arith.constant 0 : index
    %c0_23 = arith.constant 0 : index
    %c0_24 = arith.constant 0 : index
    %c0_25 = arith.constant 0 : index
    %141 = vector.load %arg7[%c0_22, %c0_23, %c0_24, %c0_25] : memref<1x1x4x128xf32, #tpu.memory_space<vmem>>, vector<1x1x4x128xf32>
    %142 = vector.shape_cast %141 : vector<1x1x4x128xf32> to vector<4x128xf32>
    %143 = vector.shape_cast %140 : vector<4x128xf32> to vector<1x1x4x128xf32>
    tpu.vector_store %arg7[%c0_22, %c0_23, %c0_24, %c0_25], %143 {strides = array<i32>} : memref<1x1x4x128xf32, #tpu.memory_space<vmem>>, vector<1x1x4x128xf32>,
    return
  }
  func.func @transform_0(%arg0: i32, %arg1: i32, %arg2: i32, %arg3: i32) -> (i32, i32, i32, i32) {
    %c0_i32 = arith.constant 0 : i32
    return %arg0, %arg1, %arg2, %arg3 : i32, i32, i32, i32
  }
  func.func @transform_1(%arg0: i32, %arg1: i32, %arg2: i32, %arg3: i32) -> i32 {
    %c0_i32 = arith.constant 0 : i32
    %c0_i32_0 = arith.constant 0 : i32
    return %c0_i32 : i32
  }
  func.func @transform_2(%arg0: i32, %arg1: i32, %arg2: i32, %arg3: i32) -> i32 {
    %c0_i32 = arith.constant 0 : i32
    %c0_i32_0 = arith.constant 0 : i32
    return %c0_i32 : i32
  }
  func.func @transform_3(%arg0: i32, %arg1: i32, %arg2: i32, %arg3: i32) -> (i32, i32, i32, i32) {
    %c0_i32 = arith.constant 0 : i32
    return %arg0, %arg1, %arg2, %arg3 : i32, i32, i32, i32
  }
}

</mosaic_0001>

<bundles_post_ra>
// kernel: tpu_custom_call.1
= control target key start
LH: loop header
LB: loop body
LE: loop exit
PB: predicated region body
PF: predicated region fallthrough
CT: control target
= control target key end

     0   :  { %s1130_s0 = inlined_call_operand.hbm [shape: f32[2,4,4,128], index: 0, kind: input, shape index: {}]   ;;  %s1131_s1 = inlined_call_operand.vmem [shape: f32[10], index: 1, kind: input, shape index: {}]   ;;  %s1132_s2 = inlined_call_operand.vmem [shape: f32[40], index: 2, kind: input, shape index: {}]   ;;  %s1133_s3 = inlined_call_operand.hbm [shape: f32[2,4,4,128], index: 3, kind: output, shape index: {}]  }
   0x1   :  { %1140 = sst [smem:[#allocation16_spill]] %s1131_s1 }
   0x2   :  { %1141 = sst [smem:[#allocation17_spill]] %s1132_s2 }
   0x3   :  { %8 = vsyncpa [#allocation3], 0 }
   0x4   :  { %10 = vsyncpa [#allocation3 + $0x1], 0 }
   0x5   :  { %11 = vsyncpa [#allocation5], 0 }
   0x6   :  { %12 = vsyncpa [#allocation8], 0 }
   0x7   :  { %13 = vsyncpa [#allocation4], 0 }
   0x8   :  { %15 = vsyncpa [#allocation4 + $0x1], 0  ;;  %s820_s12 = smov 0   ;;  %s822_s13 = smov 0  }
   0x9   :  { %s824_s14 = smov 0   ;;  %s826_s15 = smov 0  }
   0xa   :  { %s828_s16 = smov 0   ;;  %s830_s17 = smov 0  }
   0xb   :  { %s832_s18 = smov 0   ;;  %s834_s19 = smov 0  }
   0xc LB: > { %s501_s20 = sadd.s32 4294967295, %s794_s19   ;;  %s502_s21 = sadd.s32 4294967294, %s794_s19   ;;  %s794_s19 = sphi %s834_s19, %s21_s19   ;;  %s790_s18 = sphi %s832_s18, %s1166_s18   ;;  %s786_s17 = sphi %s830_s17, %s1165_s17   ;;  %s782_s16 = sphi %s828_s16, %s1164_s16   ;;  %s778_s15 = sphi %s826_s15, %s1163_s15   ;;  %s774_s14 = sphi %s824_s14, %s1162_s14   ;;  %s770_s13 = sphi %s822_s13, %s1161_s13   ;;  %s766_s12 = sphi %s820_s12, %s1160_s12  }
   0xd   : > { %p73_p0 = scmp.ne.s32.totalorder %s770_s13, %s766_s12  ;;  %p866_p1 = scmp.eq.s32.totalorder %s501_s20, 0 }
   0xe   : > { %p151_p2 = scmp.eq.s32.totalorder %s502_s21, 7  ;;  %p503_p4 = scmp.ge.s32.totalorder %s794_s19, 1 }
   0xf   : > { %s1142_s22 = scalar_select %p866_p1, 1, 0 }
  0x10   : > { %p872_p3 = por %p866_p1, %p73_p0  ;;  %p877_p5 = por %p151_p2, %p73_p0 }
  0x11   : > { %p158_p6 = scmp.lt.s32.totalorder %s794_s19, 9  ;;  %s1146_s1 = sld [smem:[#allocation16_spill]] }
  0x12   : > { %s1143_s23 = scalar_select %p872_p3, 1, 0 }
  0x13   : > { %s1144_s24 = scalar_select %p877_p5, 1, 0 }
  0x14   : > { %p885_p7 = pnand %p503_p4, %p158_p6  ;;  %s1148_s2 = sld [smem:[#allocation17_spill]] }
  0x15   : > { %1145 = sst [smem:[#allocation14_spill]] %s1144_s24 }
  0x16   : > { %s1147_s28 = scalar_select %p885_p7, 1, 0 }
  0x17   : > { %s171_s27 = sshll.u32 %s1146_s1, 4  ;;  %p541_p8 = pneg %p885_p7  ;;  %s172_s27 = int_to_ptr.vmem [resolvable:$true] %s171_s27 }
  0x18   : > { %s628_s6 = scalar_lea.vmem %s172_s27, 16  ;;  %p636_p0 = scmp.lt.s32.totalorder %s172_s27, %s172_s27 }
  0x19   : > { %p896_p9 = pnand %p541_p8, %p866_p1  ;;  %p629_p10 = scmp.ne.s32.totalorder %s172_s27, %s628_s6 }
  0x1a   : > { %s182_s4 = sshll.u32 %s1148_s2, 4  ;;  %p637_p2 = scmp.lt.s32.totalorder %s628_s6, %s628_s6  ;;  %s183_s4 = int_to_ptr.vmem [resolvable:$true] %s182_s4 }
  0x1b   : > { %p630_p11 = pneg %p896_p9 }
  0x1c   : > { %p638_p4 = por %p637_p2, %p636_p0 }
  0x1d   : > { %p631_p12 = pnand %p630_p11, %p629_p10 }
  0x1f   : > { %p632_p13 = pneg %p631_p12 }
  0x21   : > { %p639_p6 = pnand %p638_p4, %p632_p13 }
  0x23   : > { %642 = shalt.err (!%p639_p6)
}
  0x24   : > { %s796_s7 = smov [#allocation6]   ;;  %s643_s8 = scalar_lea.vmem %s183_s4, 16 }
  0x25   : > { %544 = dma.vmem_to_smem (!%p896_p9), %s172_s27, 16, %s796_s7, [#allocation5]  }
  0x26   : > { %p644_p8 = scmp.ne.s32.totalorder %s183_s4, %s643_s8  ;;  %p651_p3 = scmp.lt.s32.totalorder %s183_s4, %s183_s4 }
  0x27   : > { %p652_p7 = scmp.lt.s32.totalorder %s643_s8, %s643_s8 }
  0x28   : > { %p646_p5 = pnand %p644_p8, %p630_p11 }
  0x29   : > { %p653_p10 = por %p652_p7, %p651_p3 }
  0x2a   : > { %p647_p1 = pneg %p646_p5 }
  0x2c   : > { %p654_p12 = pnand %p653_p10, %p647_p1 }
  0x2e   : > { %657 = shalt.err (!%p654_p12)
}
  0x2f   : > { %s797_s9 = smov [#allocation7]   ;;  %p145_p5 = scmp.eq.s32.totalorder %s501_s20, 7 }
  0x30   : > { %547 = dma.vmem_to_smem (!%p896_p9), %s183_s4, 16, %s797_s9, [#allocation8]  }
  0x31   : > { %s43_s10 = sadd.s32 1, %s786_s17  ;;  %s47_s11 = sadd.s32 1, %s790_s18 }
  0x32   : > { %p45_p1 = scmp.ge.s32.totalorder %s43_s10, 4  ;;  %p67_p3 = scmp.ne.s32.totalorder %s774_s14, %s770_s13 }
  0x33   : > { %p68_p7 = scmp.eq.s32.totalorder %s794_s19, 0  ;;  %s60_s25 = sadd.s32 1, %s774_s14 }
  0x34   : > { %s1168_s10 = smov (%p45_p1, %s43_s10), 0  ;;  %s1170_s11 = smov (!%p45_p1, %s47_s11), %s790_s18 }
  0x35   : > { %1150 = sst [smem:[#allocation15_spill]] %s1168_s10  ;;  %s52_s21 = ssub.s32 %s786_s17, %s1168_s10 }
  0x36   : > { %p49_p11 = scmp.ge.s32.totalorder %s1170_s11, 2  ;;  %p919_p9 = por %p145_p5, %p67_p3 }
  0x37   : > { %p923_p13 = por %p68_p7, %p67_p3  ;;  %s193_s27 = sand.u32 1, %s774_s14  }
  0x38   : > { %s1172_s11 = smov (%p49_p11, %s1170_s11), 0  ;;  %p558_p0 = scmp.lt.s32.totalorder %s794_s19, 8 }
  0x39   : > { %s507_s29 = sshll.u32 %s193_s27, 2  ;;  %s51_s30 = ssub.s32 %s790_s18, %s1172_s11 }
  0x3a   : > { %s53_s4 = sor.u32 %s52_s21, %s51_s30  ;;  %s508_s5 = sshll.u32 %s790_s18, 2 }
  0x3b   : > { %p58_p2 = scmp.eq.s32.totalorder %s53_s4, 0  ;;  %s204_s6 = sadd.s32 %s786_s17, %s508_s5 }
  0x3c   : > { %s509_s7 = sshll.u32 %s204_s6, 6  ;;  %s197_s8 = scalar_lea.vmem [#allocation2], %s507_s29 }
  0x3d   : > { %s208_s9 = sshll.u32 %s197_s8, 4  ;;  %s941_s24 = scalar_lea.hbm %s1130_s0, %s509_s7  ;;  %s943_s9 = int_to_ptr.vmem [resolvable:$true] %s208_s9 }
  0x3e   : > { %s936_s1 = scalar_select %p58_p2, %s774_s14, %s60_s25  }
  0x3f   : > { %p949_p4 = pnand %p558_p0, %p923_p13  ;;  %s194_s25 = scalar_lea.sflag [#allocation3], %s193_s27 }
  0x40   : > { %s658_s29 = scalar_lea.hbm %s941_s24, 64  ;;  %s663_s20 = scalar_lea.hbm %s1130_s0, 512 }
  0x41   : > { %p659_p6 = scmp.ne.s32.totalorder %s941_s24, %s658_s29  ;;  %p660_p8 = pneg %p949_p4 }
  0x42   : > { %p664_p5 = scmp.lt.u32.totalorder %s941_s24, %s1130_s0  ;;  %p665_p1 = scmp.lt.u32.totalorder %s663_s20, %s658_s29 }
  0x43   : > { %p661_p10 = pnand %p660_p8, %p659_p6  ;;  %p667_p7 = scmp.lt.u32.totalorder %s658_s29, %s941_s24 }
  0x44   : > { %p666_p3 = por %p665_p1, %p664_p5 }
  0x45   : > { %p662_p12 = pneg %p661_p10 }
  0x46   : > { %p668_p11 = por %p667_p7, %p666_p3 }
  0x48   : > { %p669_p13 = pnand %p668_p11, %p662_p12 }
  0x4a   : > { %672 = shalt.err (!%p669_p13)
}
  0x4b   : > { %s673_s27 = scalar_lea.vmem %s943_s9, 64  ;;  %s798_s5 = smov [#allocation2]  }
  0x4c   : > { %p674_p0 = scmp.ne.s32.totalorder %s943_s9, %s673_s27  ;;  %s678_s6 = sshll.u32 %s798_s5, 4  ;;  %s679_s6 = int_to_ptr.vmem [resolvable:$false] %s678_s6 }
  0x4d   : > { %s680_s7 = scalar_lea.vmem %s679_s6, 128  ;;  %p681_p10 = scmp.lt.s32.totalorder %s943_s9, %s679_s6 }
  0x4e   : > { %p676_p2 = pnand %p674_p0, %p660_p8  ;;  %p682_p5 = scmp.lt.s32.totalorder %s680_s7, %s673_s27 }
  0x50   : > { %p677_p6 = pneg %p676_p2  ;;  %p683_p1 = por %p682_p5, %p681_p10 }
  0x52   : > { %p684_p3 = pnand %p683_p1, %p677_p6 }
  0x54   : > { %687 = shalt.err (!%p684_p3)
}
  0x55   : > { %551 = dma.hbm_to_vmem [thread:$0]  (!%p949_p4), %s941_s24, 64, %s943_s9, %s194_s25  }
  0x56   : > { %p1154_p12 = scmp.ne.s32.totalorder %s1147_s28, 0 }
  0x57   : > { %s981_s8 = sand.u32 (!%p1154_p12), 1, %s770_s13   ;;  %p1155_p8 = scmp.ne.s32.totalorder (!%p1154_p12), %s1143_s23, 0 }
  0x58   : > { %217 = sbr.rel (%p1154_p12) target bundleno = 152 (0x98), region = 32  ;;  %s511_s29 = sshll.u32 (!%p1154_p12), %s981_s8, 2 }
  0x59   : > { %s220_s2 = scalar_lea.sflag (!%p1154_p12), [#allocation3], %s981_s8  ;;  %s223_s10 = scalar_lea.vmem (!%p1154_p12), [#allocation2], %s511_s29 }
  0x5f   : > { %749 = dma.done.wait (%p1155_p8), %s220_s2, 64  }
  0x60   : > { %751 = vsyncadd (%p1155_p8), %s220_s2, 4294967232  ;;  %p1156_p4 = scmp.ne.s32.totalorder %s1142_s22, 0 }
  0x62   : > { %753 = dma.done.wait (%p1156_p4), [#allocation5], 16  }
  0x63   : > { %755 = vsyncadd (%p1156_p4), [#allocation5], 4294967280 }
  0x64   : > { %757 = dma.done.wait (%p1156_p4), [#allocation8], 16  }
  0x65   : > { %759 = vsyncadd (%p1156_p4), [#allocation8], 4294967280 }
  0x66   : > { %236 = sfence }
  0x67   : > { %s256_s24 = sld [smem:[#allocation6]]  ;;  %s1000_s28 = smul.u32 10, %s778_s15  ;;  %v1004_v0 = vld [vmem:[%s223_s10] sm:$0xf] }
  0x68   : > { %s515_s23 = sld [smem:[#allocation6 + $0x1]]  ;;  %s516_s9 = sld [smem:[#allocation6 + $0x2]] }
  0x69   : > { %s517_s21 = sld [smem:[#allocation6 + $0x3]]  ;;  %s270_s20 = sadd.s32 1, %s1000_s28 }
  0x6a   : > { %s261_s25 = sld [smem:[#allocation7 + %s1000_s28]]  ;;  %s281_s30 = sadd.s32 2, %s1000_s28 }
  0x6b   : > { %s1006_s22 = sld [smem:[#allocation7 + %s270_s20]]  ;;  %s292_s27 = sadd.s32 3, %s1000_s28 }
  0x6c   : > { %s1009_s4 = sld [smem:[#allocation7 + %s281_s30]]  ;;  %s303_s7 = sadd.s32 4, %s1000_s28 }
  0x6d   : > { %v257_v1 = vstv %s256_s24  ;;  %s1012_s5 = sld [smem:[#allocation7 + %s292_s27]]  ;;  %s314_s24 = sadd.s32 5, %s1000_s28 }
  0x6e   : > { %s1014_s6 = sld [smem:[#allocation6 + $0x4]]  ;;  %v258_v2 = vsub.f32 %v1004_v0, %v257_v1  ;;  %v267_v3 = vstv %s515_s23  ;;  %s1018_s2 = sld [smem:[#allocation6 + $0x5]]  ;;  %v278_v5 = vstv %s516_s9 }
  0x6f   : > { %v268_v4 = vsub.f32 %v1004_v0, %v267_v3  ;;  %v289_v6 = vstv %s517_s21  ;;  %s1021_s10 = sld [smem:[#allocation7 + %s303_s7]]  ;;  %v279_v9 = vsub.f32 %v1004_v0, %v278_v5  ;;  %s325_s9 = sadd.s32 6, %s1000_s28 }
  0x70   : > { %v259_v7 = vmax.f32 %v258_v2, 0.0  ;;  %v262_v8 = vstv %s261_s25  ;;  %v290_v10 = vsub.f32 %v1004_v0, %v289_v6  ;;  %s1026_s23 = sld [smem:[#allocation7 + %s314_s24]]  ;;  %s336_s30 = sadd.s32 7, %s1000_s28 }
  0x71   : > { %s1028_s20 = sld [smem:[#allocation6 + $0x6]]  ;;  %v269_v11 = vmax.f32 %v268_v4, 0.0  ;;  %v272_v12 = vstv %s1006_s22  ;;  %s1032_s21 = sld [smem:[#allocation6 + $0x7]]  ;;  %v280_v15 = vmax.f32 %v279_v9, 0.0 }
  0x72   : > { %v263_v13 = vmul.f32 %v262_v8, %v259_v7  ;;  %v264_v14 = vmul.f32 %v259_v7, %v259_v7  ;;  %v283_v16 = vstv %s1009_s4  ;;  %s1035_s25 = sld [smem:[#allocation7 + %s325_s9]]  ;;  %v291_v19 = vmax.f32 %v290_v10, 0.0  ;;  %s347_s4 = sadd.s32 8, %s1000_s28 }
  0x73   : > { %v273_v17 = vmul.f32 %v272_v12, %v269_v11  ;;  %v274_v18 = vmul.f32 %v269_v11, %v269_v11  ;;  %v294_v20 = vstv %s1012_s5  ;;  %s1039_s27 = sld [smem:[#allocation7 + %s336_s30]]  ;;  %v284_v22 = vmul.f32 %v283_v16, %v280_v15  ;;  %s358_s24 = sadd.s32 9, %s1000_s28 }
  0x74   : > { %s1041_s22 = sld [smem:[#allocation6 + $0x8]]  ;;  %v265_v21 = vmul.f32 %v264_v14, %v263_v13  ;;  %v285_v23 = vmul.f32 %v280_v15, %v280_v15  ;;  %v300_v24 = vstv %s1014_s6  ;;  %s1045_s7 = sld [smem:[#allocation6 + $0x9]]  ;;  %v295_v26 = vmul.f32 %v294_v20, %v291_v19 }
  0x75   : > { %v275_v25 = vmul.f32 %v274_v18, %v273_v17  ;;  %v296_v27 = vmul.f32 %v291_v19, %v291_v19  ;;  %v301_v28 = vsub.f32 %v1004_v0, %v300_v24  ;;  %s1048_s5 = sld [smem:[#allocation7 + %s347_s4]]  ;;  %v305_v30 = vstv %s1021_s10  ;;  %s525_s28 = sshll.u32 %s782_s16, 2 }
  0x76   : > { %v286_v29 = vmul.f32 %v285_v23, %v284_v22  ;;  %v311_v31 = vstv %s1018_s2  ;;  %v316_v36 = vstv %s1026_s23  ;;  %s1058_s6 = sld [smem:[#allocation7 + %s358_s24]]  ;;  %s380_s2 = sadd.s32 %s778_s15, %s525_s28 }
  0x77   : > { %v276_v32 = vadd.f32 %v275_v25, %v265_v21  ;;  %v297_v33 = vmul.f32 %v296_v27, %v295_v26  ;;  %v302_v34 = vmax.f32 %v301_v28, 0.0  ;;  %v312_v35 = vsub.f32 %v1004_v0, %v311_v31  ;;  %s254_s10 = scalar_lea.vmem [#allocation9], %s511_s29  ;;  %s799_s29 = smov [#allocation9]  }
  0x78   : > { %v322_v37 = vstv %s1028_s20  ;;  %v327_v38 = vstv %s1035_s25  ;;  %v333_v39 = vstv %s1032_s21  ;;  %s384_s23 = sshll.u32 %s254_s10, 4  ;;  %s526_s20 = sshll.u32 %s380_s2, 6  ;;  %s1073_s23 = int_to_ptr.vmem [resolvable:$true] %s384_s23 }
  0x79   : > { %v287_v40 = vadd.f32 %v286_v29, %v276_v32  ;;  %v306_v41 = vmul.f32 %v305_v30, %v302_v34  ;;  %v307_v42 = vmul.f32 %v302_v34, %v302_v34  ;;  %v313_v43 = vmax.f32 %v312_v35, 0.0  ;;  %s1078_s15 = scalar_lea.hbm %s1133_s3, %s526_s20  ;;  %s367_s21 = scalar_lea.sflag [#allocation4], %s981_s8 }
  0x7a   : > { %v323_v44 = vsub.f32 %v1004_v0, %v322_v37  ;;  %v334_v45 = vsub.f32 %v1004_v0, %v333_v39  ;;  %v338_v46 = vstv %s1039_s27  ;;  %v344_v47 = vstv %s1041_s22  ;;  %s688_s25 = scalar_lea.vmem %s1073_s23, 64  ;;  %s692_s30 = sshll.u32 %s799_s29, 4  ;;  %s693_s30 = int_to_ptr.vmem [resolvable:$false] %s692_s30 }
  0x7b   : > { %v298_v48 = vadd.f32 %v297_v33, %v287_v40  ;;  %v308_v49 = vmul.f32 %v307_v42, %v306_v41  ;;  %v317_v50 = vmul.f32 %v316_v36, %v313_v43  ;;  %v318_v51 = vmul.f32 %v313_v43, %v313_v43  ;;  %p689_p7 = scmp.ne.s32.totalorder %s1073_s23, %s688_s25  ;;  %s694_s27 = scalar_lea.vmem %s693_s30, 128 }
  0x7c   : > { %v324_v52 = vmax.f32 %v323_v44, 0.0  ;;  %v335_v53 = vmax.f32 %v334_v45, 0.0  ;;  %v345_v54 = vsub.f32 %v1004_v0, %v344_v47  ;;  %v349_v57 = vstv %s1048_s5  ;;  %p695_p0 = scmp.lt.s32.totalorder %s1073_s23, %s693_s30  ;;  %p696_p2 = scmp.lt.s32.totalorder %s694_s27, %s688_s25 }
  0x7d   : > { %v309_v55 = vadd.f32 %v308_v49, %v298_v48  ;;  %v319_v56 = vmul.f32 %v318_v51, %v317_v50  ;;  %v355_v58 = vstv %s1045_s7  ;;  %v360_v5 = vstv %s1058_s6  ;;  %p690_p11 = pnand %p689_p7, %p919_p9 }
  0x7e   : > { %v328_v59 = vmul.f32 %v327_v38, %v324_v52  ;;  %v329_v60 = vmul.f32 %v324_v52, %v324_v52  ;;  %v339_v61 = vmul.f32 %v338_v46, %v335_v53  ;;  %v340_v62 = vmul.f32 %v335_v53, %v335_v53  ;;  %p697_p6 = por %p696_p2, %p695_p0 }
  0x7f   : > { %v320_v63 = vadd.f32 %v319_v56, %v309_v55  ;;  %v346_v1 = vmax.f32 %v345_v54, 0.0  ;;  %v356_v2 = vsub.f32 %v1004_v0, %v355_v58  ;;  %p691_p13 = pneg %p690_p11 }
  0x80   : > { %v330_v3 = vmul.f32 %v329_v60, %v328_v59  ;;  %v341_v4 = vmul.f32 %v340_v62, %v339_v61 }
  0x81   : > { %v350_v6 = vmul.f32 %v349_v57, %v346_v1  ;;  %v351_v7 = vmul.f32 %v346_v1, %v346_v1  ;;  %v357_v8 = vmax.f32 %v356_v2, 0.0  ;;  %p698_p10 = pnand %p697_p6, %p691_p13 }
  0x82   : > { %v331_v9 = vadd.f32 %v330_v3, %v320_v63 }
  0x83   : > { %v352_v10 = vmul.f32 %v351_v7, %v350_v6  ;;  %v361_v11 = vmul.f32 %v360_v5, %v357_v8  ;;  %v362_v12 = vmul.f32 %v357_v8, %v357_v8 }
  0x84   : > { %v342_v13 = vadd.f32 %v341_v4, %v331_v9 }
  0x85   : > { %v363_v14 = vmul.f32 %v362_v12, %v361_v11 }
  0x86   : > { %v353_v0 = vadd.f32 %v352_v10, %v342_v13 }
  0x88   : > { %v364_v15 = vadd.f32 %v363_v14, %v353_v0 }
  0x8a   : > { %365 = vst [vmem:[%s254_s10] sm:$0xf] %v364_v15 }
  0x8b   : > { %701 = shalt.err (!%p698_p10)
}
  0x8c   : > { %s702_s8 = scalar_lea.hbm %s1078_s15, 64  ;;  %s706_s7 = scalar_lea.hbm %s1133_s3, 512 }
  0x8d   : > { %p703_p5 = scmp.ne.s32.totalorder %s1078_s15, %s702_s8  ;;  %p707_p12 = scmp.lt.u32.totalorder %s1078_s15, %s1133_s3 }
  0x8e   : > { %p708_p8 = scmp.lt.u32.totalorder %s706_s7, %s702_s8  ;;  %p710_p7 = scmp.lt.u32.totalorder %s702_s8, %s1078_s15 }
  0x8f   : > { %p704_p1 = pnand %p703_p5, %p919_p9 }
  0x90   : > { %p709_p4 = por %p708_p8, %p707_p12 }
  0x91   : > { %p705_p3 = pneg %p704_p1 }
  0x92   : > { %p711_p11 = por %p710_p7, %p709_p4 }
  0x94   : > { %p712_p13 = pnand %p711_p11, %p705_p3 }
  0x96   : > { %715 = shalt.err (!%p712_p13)
}
  0x97   : > { %539 = dma.vmem_to_hbm [thread:$0]  (%p919_p9), %s1073_s23, 64, %s1078_s15, %s367_s21  }
  0x98 PF: > { %s1157_s6 = sld [smem:[#allocation14_spill]]  ;;  %p561_p0 = scmp.ge.s32.totalorder %s794_s19, 2 }
  0x99   : > { %s396_s28 = sand.u32 1, %s766_s12  }
  0x9a   : > { %s397_s2 = scalar_lea.sflag [#allocation4], %s396_s28 }
  0x9e   : > { %p1158_p2 = scmp.ne.s32.totalorder %s1157_s6, 0 }
  0xa0   : > { %p553_p6 = pnand %p561_p0, %p1158_p2 }
  0xa2   : > { %761 = dma.done.wait (!%p553_p6), %s397_s2, 64  }
  0xa3   : > { %763 = vsyncadd (!%p553_p6), %s397_s2, 4294967232  ;;  %s21_s19 = sadd.s32 1, %s794_s19   ;;  %s1159_s26 = sld [smem:[#allocation15_spill]] }
  0xa4   : > { %p18_p10 = scmp.ge.s32.totalorder %s21_s19, 10   ;;  %s1160_s12 = smov %s770_s13 }
  0xa5   : > { %s1161_s13 = smov %s774_s14  ;;  %s1162_s14 = smov %s936_s1 }
  0xa6   : > { %s1163_s15 = smov %s786_s17  ;;  %s1164_s16 = smov %s790_s18 }
  0xa7   : > { %s1166_s18 = smov %s1172_s11  ;;  %20 = sbr.rel (!%p18_p10) target bundleno = 12 (0xc), region = 86 }
  0xa9   : > { %s1165_s17 = smov %s1159_s26 }
  0xae   :  { %402 = vsyncpa [#allocation3], 1 }
  0xaf   :  { %404 = vsyncpa [#allocation3 + $0x1], 1 }
  0xb0   :  { %405 = vsyncpa [#allocation4], 1 }
  0xb1   :  { %407 = vsyncpa [#allocation4 + $0x1], 1 }
  0xb2   :  { %408 = vsyncpa [#allocation5], 1 }
  0xb3   :  { %410 = vsyncpa [#allocation5 + $0x1], 1 }
  0xb4   :  { %411 = vsyncpa [#allocation8], 1 }

</bundles_post_ra>
